<compile_context>
chip_gen: v6e
topology: v6e:2x2x1
jax: 0.10.0
libtpu: 0.0.40
codegen_flags: <defaults>
</compile_context>

<pallas_src>
import jax
import jax.numpy as jnp
from jax.experimental import pallas as pl
from jax.experimental.pallas import tpu as pltpu

INPUT_DIM = 1200
HIDDEN1 = 10
HIDDEN2 = 3
OUTPUT_DIM = 2

# Padded (hardware-friendly) dims.
K1_PAD = 1280   # 1200 -> 10 * 128
H1_PAD = 128    # 10   -> 128
H2_PAD = 128    # 3    -> 128

TB_MAX = 1024   # max batch-tile rows (fits default scoped VMEM on v5e/v6e/v7x)


def _round_up(n, m):
    return ((n + m - 1) // m) * m


def mlp_kernel(x_ref, w1_ref, b1_ref, w2_ref, b2_ref, w3_ref, b3_ref, o_ref):
    x = x_ref[...]

    # Layer 1: Linear(1280pad, 128pad) + ReLU   (dominant MXU work; f32 acc)
    h1 = jnp.dot(x, w1_ref[...], preferred_element_type=jnp.float32) + b1_ref[...]
    h1 = jnp.maximum(h1, 0.0)

    # Layer 2: Linear(128pad, 128pad) + ReLU
    h2 = jnp.dot(h1, w2_ref[...], preferred_element_type=jnp.float32) + b2_ref[...]
    h2 = jnp.maximum(h2, 0.0)

    # Layer 3: Linear(128pad, 2) -> logits
    logits = jnp.dot(h2, w3_ref[...], preferred_element_type=jnp.float32) + b3_ref[...]
    o_ref[...] = logits.astype(o_ref.dtype)


def mlp_forward(x, w1, b1, w2, b2, w3, b3):
    """x: (batch, 1200) f32. Weights in (in_features, out_features) layout,
    biases (1, out_features) — i.e. y = x @ W + b, matching torch nn.Linear."""
    batch = x.shape[0]

    # Choose batch tile: round batch up to a sublane multiple (8); cap at TB_MAX.
    pb8 = _round_up(batch, 8)
    if pb8 >= TB_MAX:
        tb = TB_MAX
        pb = _round_up(batch, tb)
    else:
        tb = pb8
        pb = pb8

    # Host-side zero padding (inert: padded K-columns are zero in both x and W;
    # padded hidden units have zero weight+bias so ReLU keeps them at zero).
    xp = jnp.zeros((pb, K1_PAD), jnp.float32).at[:batch, :INPUT_DIM].set(x)
    w1p = jnp.zeros((K1_PAD, H1_PAD), jnp.float32).at[:INPUT_DIM, :HIDDEN1].set(w1)
    b1p = jnp.zeros((1, H1_PAD), jnp.float32).at[:, :HIDDEN1].set(b1)
    w2p = jnp.zeros((H1_PAD, H2_PAD), jnp.float32).at[:HIDDEN1, :HIDDEN2].set(w2)
    b2p = jnp.zeros((1, H2_PAD), jnp.float32).at[:, :HIDDEN2].set(b2)
    w3p = jnp.zeros((H2_PAD, OUTPUT_DIM), jnp.float32).at[:HIDDEN2, :].set(w3)
    b3p = b3.reshape(1, OUTPUT_DIM).astype(jnp.float32)

    grid = (pb // tb,)

    # Roofline hint: dominated by reading x and the layer-1 matmul.
    weight_bytes = 4 * (K1_PAD * H1_PAD + H1_PAD + H1_PAD * H2_PAD + H2_PAD
                        + H2_PAD * OUTPUT_DIM + OUTPUT_DIM)
    cost = pl.CostEstimate(
        flops=2 * pb * (K1_PAD * H1_PAD + H1_PAD * H2_PAD + H2_PAD * OUTPUT_DIM),
        transcendentals=0,
        bytes_accessed=pb * K1_PAD * 4 + pb * OUTPUT_DIM * 4 + weight_bytes,
    )

    out_padded = pl.pallas_call(
        mlp_kernel,
        out_shape=jax.ShapeDtypeStruct((pb, OUTPUT_DIM), jnp.float32),
        grid_spec=pltpu.PrefetchScalarGridSpec(
            num_scalar_prefetch=0,
            grid=grid,
            in_specs=[
                pl.BlockSpec((tb, K1_PAD), lambda i: (i, 0)),          # x: streamed
                pl.BlockSpec((K1_PAD, H1_PAD), lambda i: (0, 0)),      # w1: resident
                pl.BlockSpec((1, H1_PAD), lambda i: (0, 0)),           # b1
                pl.BlockSpec((H1_PAD, H2_PAD), lambda i: (0, 0)),      # w2
                pl.BlockSpec((1, H2_PAD), lambda i: (0, 0)),           # b2
                pl.BlockSpec((H2_PAD, OUTPUT_DIM), lambda i: (0, 0)),  # w3
                pl.BlockSpec((1, OUTPUT_DIM), lambda i: (0, 0)),       # b3
            ],
            out_specs=pl.BlockSpec((tb, OUTPUT_DIM), lambda i: (i, 0)),
        ),
        compiler_params=pltpu.CompilerParams(
            dimension_semantics=("parallel",),  # shards batch tiles on v7x's 2 TCs
        ),
        cost_estimate=cost,
    )(xp, w1p, b1p, w2p, b2p, w3p, b3p)

    return out_padded[:batch]


def init_linear_params(key, in_features, out_features):
    """Deterministic init mimicking torch.nn.Linear default (uniform ±1/sqrt(fan_in)).
    Weight returned as (in_features, out_features) so the kernel can do x @ W."""
    kw, kb = jax.random.split(key)
    bound = 1.0 / jnp.sqrt(jnp.float32(in_features))
    w = jax.random.uniform(kw, (in_features, out_features), jnp.float32, -bound, bound)
    b = jax.random.uniform(kb, (1, out_features), jnp.float32, -bound, bound)
    return w, b


def reference_forward(x, w1, b1, w2, b2, w3, b3):
    h1 = jnp.maximum(x @ w1 + b1, 0.0)
    h2 = jnp.maximum(h1 @ w2 + b2, 0.0)
    return h2 @ w3 + b3


if __name__ == "__main__":
    key = jax.random.PRNGKey(0)
    kx, k1, k2, k3 = jax.random.split(key, 4)

    batch = 2
    x = jax.random.normal(kx, (batch, INPUT_DIM), jnp.float32)

    w1, b1 = init_linear_params(k1, INPUT_DIM, HIDDEN1)
    w2, b2 = init_linear_params(k2, HIDDEN1, HIDDEN2)
    w3, b3 = init_linear_params(k3, HIDDEN2, OUTPUT_DIM)

    out = mlp_forward(x, w1, b1, w2, b2, w3, b3)
    out = jax.block_until_ready(out)

    ref = reference_forward(x, w1, b1, w2, b2, w3, b3)
    assert out.shape == (batch, OUTPUT_DIM)
    assert jnp.allclose(out, ref, atol=1e-4, rtol=1e-4), "Pallas output mismatch vs reference"

    # Also sanity-check a larger, non-tile-multiple batch exercising the grid path.
    big = jax.random.normal(kx, (2050, INPUT_DIM), jnp.float32)
    out_big = jax.block_until_ready(mlp_forward(big, w1, b1, w2, b2, w3, b3))
    ref_big = reference_forward(big, w1, b1, w2, b2, w3, b3)
    assert out_big.shape == (2050, OUTPUT_DIM)
    assert jnp.allclose(out_big, ref_big, atol=1e-4, rtol=1e-4), "Pallas grid-path mismatch"

    print("KERNEL_OK")
</pallas_src>

<mosaic_0001>
module attributes {stable_mosaic.version = 11 : i64} {
  func.func @mlp_kernel(%arg0: i32, %arg1: memref<8x1280xf32, #tpu.memory_space<vmem>>, %arg2: memref<1280x128xf32, #tpu.memory_space<vmem>>, %arg3: memref<1x128xf32, #tpu.memory_space<vmem>>, %arg4: memref<128x128xf32, #tpu.memory_space<vmem>>, %arg5: memref<1x128xf32, #tpu.memory_space<vmem>>, %arg6: memref<128x2xf32, #tpu.memory_space<vmem>>, %arg7: memref<1x2xf32, #tpu.memory_space<vmem>>, %arg8: memref<8x2xf32, #tpu.memory_space<vmem>>) attributes {dimension_semantics = [#tpu.dimension_semantics<parallel>], iteration_bounds = array<i64: 1>, scalar_prefetch = 0 : i64, scratch_operands = 0 : i64, tpu.core_type = #tpu.core_type<tc>, window_params = [{transform_indices = @transform_0, window_bounds = array<i64: 8, 1280>}, {pipeline_mode = #tpu.pipeline_mode<synchronous>, transform_indices = @transform_1, window_bounds = array<i64: 1280, 128>}, {pipeline_mode = #tpu.pipeline_mode<synchronous>, transform_indices = @transform_2, window_bounds = array<i64: 1, 128>}, {pipeline_mode = #tpu.pipeline_mode<synchronous>, transform_indices = @transform_3, window_bounds = array<i64: 128, 128>}, {pipeline_mode = #tpu.pipeline_mode<synchronous>, transform_indices = @transform_4, window_bounds = array<i64: 1, 128>}, {pipeline_mode = #tpu.pipeline_mode<synchronous>, transform_indices = @transform_5, window_bounds = array<i64: 128, 2>}, {pipeline_mode = #tpu.pipeline_mode<synchronous>, transform_indices = @transform_6, window_bounds = array<i64: 1, 2>}, {transform_indices = @transform_7, window_bounds = array<i64: 8, 2>}]} {
    %c0 = arith.constant 0 : index
    %c0_0 = arith.constant 0 : index
    %0 = vector.load %arg1[%c0, %c0_0] : memref<8x1280xf32, #tpu.memory_space<vmem>>, vector<8x1280xf32>
    %c0_1 = arith.constant 0 : index
    %c0_2 = arith.constant 0 : index
    %1 = vector.load %arg2[%c0_1, %c0_2] : memref<1280x128xf32, #tpu.memory_space<vmem>>, vector<1280x128xf32>
    %cst = arith.constant dense<0.000000e+00> : vector<8x128xf32>
    %2 = tpu.matmul %0, %1, %cst {dimension_numbers = #tpu.dot_dimension_numbers<[1], [0], [0], [1], [0, 0, 1, 1], [], []>} : vector<8x1280xf32>, vector<1280x128xf32>, vector<8x128xf32> -> vector<8x128xf32>
    %c0_3 = arith.constant 0 : index
    %c0_4 = arith.constant 0 : index
    %3 = vector.load %arg3[%c0_3, %c0_4] : memref<1x128xf32, #tpu.memory_space<vmem>>, vector<1x128xf32>
    %4 = vector.broadcast %3 : vector<1x128xf32> to vector<8x128xf32>
    %5 = arith.addf %2, %4 : vector<8x128xf32>
    %cst_5 = arith.constant 0.000000e+00 : f32
    %6 = vector.broadcast %cst_5 : f32 to vector<8x128xf32>
    %7 = arith.maximumf %5, %6 : vector<8x128xf32>
    %c0_6 = arith.constant 0 : index
    %c0_7 = arith.constant 0 : index
    %8 = vector.load %arg4[%c0_6, %c0_7] : memref<128x128xf32, #tpu.memory_space<vmem>>, vector<128x128xf32>
    %cst_8 = arith.constant dense<0.000000e+00> : vector<8x128xf32>
    %9 = tpu.matmul %7, %8, %cst_8 {dimension_numbers = #tpu.dot_dimension_numbers<[1], [0], [0], [1], [0, 0, 1, 1], [], []>} : vector<8x128xf32>, vector<128x128xf32>, vector<8x128xf32> -> vector<8x128xf32>
    %c0_9 = arith.constant 0 : index
    %c0_10 = arith.constant 0 : index
    %10 = vector.load %arg5[%c0_9, %c0_10] : memref<1x128xf32, #tpu.memory_space<vmem>>, vector<1x128xf32>
    %11 = vector.broadcast %10 : vector<1x128xf32> to vector<8x128xf32>
    %12 = arith.addf %9, %11 : vector<8x128xf32>
    %cst_11 = arith.constant 0.000000e+00 : f32
    %13 = vector.broadcast %cst_11 : f32 to vector<8x128xf32>
    %14 = arith.maximumf %12, %13 : vector<8x128xf32>
    %c0_12 = arith.constant 0 : index
    %c0_13 = arith.constant 0 : index
    %15 = vector.load %arg6[%c0_12, %c0_13] : memref<128x2xf32, #tpu.memory_space<vmem>>, vector<128x2xf32>
    %cst_14 = arith.constant dense<0.000000e+00> : vector<8x2xf32>
    %16 = tpu.matmul %14, %15, %cst_14 {dimension_numbers = #tpu.dot_dimension_numbers<[1], [0], [0], [1], [0, 0, 1, 1], [], []>} : vector<8x128xf32>, vector<128x2xf32>, vector<8x2xf32> -> vector<8x2xf32>
    %c0_15 = arith.constant 0 : index
    %c0_16 = arith.constant 0 : index
    %17 = vector.load %arg7[%c0_15, %c0_16] : memref<1x2xf32, #tpu.memory_space<vmem>>, vector<1x2xf32>
    %18 = vector.broadcast %17 : vector<1x2xf32> to vector<8x2xf32>
    %19 = arith.addf %16, %18 : vector<8x2xf32>
    %c0_17 = arith.constant 0 : index
    %c0_18 = arith.constant 0 : index
    %20 = vector.load %arg8[%c0_17, %c0_18] : memref<8x2xf32, #tpu.memory_space<vmem>>, vector<8x2xf32>
    tpu.vector_store %arg8[%c0_17, %c0_18], %19 {strides = array<i32>} : memref<8x2xf32, #tpu.memory_space<vmem>>, vector<8x2xf32>,
    return
  }
  func.func @transform_0(%arg0: i32) -> (i32, i32) {
    %c0_i32 = arith.constant 0 : i32
    %c0_i32_0 = arith.constant 0 : i32
    return %arg0, %c0_i32 : i32, i32
  }
  func.func @transform_1(%arg0: i32) -> (i32, i32) {
    %c0_i32 = arith.constant 0 : i32
    %c0_i32_0 = arith.constant 0 : i32
    %c0_i32_1 = arith.constant 0 : i32
    return %c0_i32, %c0_i32_0 : i32, i32
  }
  func.func @transform_2(%arg0: i32) -> (i32, i32) {
    %c0_i32 = arith.constant 0 : i32
    %c0_i32_0 = arith.constant 0 : i32
    %c0_i32_1 = arith.constant 0 : i32
    return %c0_i32, %c0_i32_0 : i32, i32
  }
  func.func @transform_3(%arg0: i32) -> (i32, i32) {
    %c0_i32 = arith.constant 0 : i32
    %c0_i32_0 = arith.constant 0 : i32
    %c0_i32_1 = arith.constant 0 : i32
    return %c0_i32, %c0_i32_0 : i32, i32
  }
  func.func @transform_4(%arg0: i32) -> (i32, i32) {
    %c0_i32 = arith.constant 0 : i32
    %c0_i32_0 = arith.constant 0 : i32
    %c0_i32_1 = arith.constant 0 : i32
    return %c0_i32, %c0_i32_0 : i32, i32
  }
  func.func @transform_5(%arg0: i32) -> (i32, i32) {
    %c0_i32 = arith.constant 0 : i32
    %c0_i32_0 = arith.constant 0 : i32
    %c0_i32_1 = arith.constant 0 : i32
    return %c0_i32, %c0_i32_0 : i32, i32
  }
  func.func @transform_6(%arg0: i32) -> (i32, i32) {
    %c0_i32 = arith.constant 0 : i32
    %c0_i32_0 = arith.constant 0 : i32
    %c0_i32_1 = arith.constant 0 : i32
    return %c0_i32, %c0_i32_0 : i32, i32
  }
  func.func @transform_7(%arg0: i32) -> (i32, i32) {
    %c0_i32 = arith.constant 0 : i32
    %c0_i32_0 = arith.constant 0 : i32
    return %arg0, %c0_i32 : i32, i32
  }
}

</mosaic_0001>

<bundles_post_ra>
// kernel: tpu_custom_call.1
= control target key start
LH: loop header
LB: loop body
LE: loop exit
PB: predicated region body
PF: predicated region fallthrough
CT: control target
= control target key end

     0   :  { %12 = vsyncpa [#allocation3], 0  ;;  %s1301_s0 = inlined_call_operand.hbm [shape: f32[8,1280], index: 0, kind: input, shape index: {}]   ;;  %s1302_s1 = inlined_call_operand.hbm [shape: f32[1280,128], index: 1, kind: input, shape index: {}]   ;;  %s1303_s2 = inlined_call_operand.vmem [shape: f32[1,128], index: 2, kind: input, shape index: {}]   ;;  %s1304_s3 = inlined_call_operand.vmem [shape: f32[128,128], index: 3, kind: input, shape index: {}]   ;;  %s1305_s4 = inlined_call_operand.vmem [shape: f32[1,128], index: 4, kind: input, shape index: {}]   ;;  %s1306_s5 = inlined_call_operand.vmem [shape: f32[128,2], index: 5, kind: input, shape index: {}]   ;;  %s1307_s6 = inlined_call_operand.vmem [shape: f32[1,2], index: 6, kind: input, shape index: {}]   ;;  %s1308_s7 = inlined_call_operand.vmem [shape: f32[8,2], index: 7, kind: output, shape index: {}]  }
   0x1   :  { %13 = vsyncpa [#allocation5], 0  ;;  %s1107_s24 = smov [#allocation2]   ;;  %s1108_s26 = smov [#allocation4]  }
   0x2   :  { %s20_s25 = sshll.u32 %s1107_s24, 4  ;;  %s29_s27 = sshll.u32 %s1108_s26, 4  ;;  %s21_s25 = int_to_ptr.vmem [resolvable:$true] %s20_s25  ;;  %s30_s27 = int_to_ptr.vmem [resolvable:$true] %s29_s27 }
   0x3   :  { %s1071_s28 = scalar_lea.vmem %s21_s25, 1280  ;;  %p1076_p1 = scmp.lt.s32.totalorder %s21_s25, %s21_s25 }
   0x4   :  { %p1072_p0 = scmp.ne.s32.totalorder %s21_s25, %s1071_s28  ;;  %p1077_p2 = scmp.lt.s32.totalorder %s1071_s28, %s1071_s28 }
   0x6   :  { %p1078_p3 = por %p1077_p2, %p1076_p1 }
   0x8   :  { %p1079_p4 = pnand %p1078_p3, %p1072_p0 }
   0xa   :  { %1082 = shalt.err (!%p1079_p4)
}
   0xb   :  { %23 = dma.hbm_to_vmem [thread:$0]  %s1301_s0, 1280, %s21_s25, [#allocation3]  }
   0xc   :  { %s1091_s8 = scalar_lea.vmem %s30_s27, 20480  ;;  %p1096_p6 = scmp.lt.s32.totalorder %s30_s27, %s30_s27 }
   0xd   :  { %p1092_p5 = scmp.ne.s32.totalorder %s30_s27, %s1091_s8  ;;  %p1097_p7 = scmp.lt.s32.totalorder %s1091_s8, %s1091_s8 }
   0xf   :  { %p1098_p8 = por %p1097_p7, %p1096_p6 }
  0x11   :  { %p1099_p9 = pnand %p1098_p8, %p1092_p5 }
  0x13   :  { %1102 = shalt.err (!%p1099_p9)
}
  0x14   :  { %s1109_s9 = smov 128   ;;  %s1110_s10 = smov 8  }
  0x15   :  { %35 = dma.hbm_to_vmem [thread:$0]  %s1302_s1, 20480, %s30_s27, [#allocation5], %s1109_s9, %s1109_s9, %s1110_s10  }
  0x16   :  { %1103 = dma.done.wait [#allocation3], 1280  }
  0x17   :  { %1104 = vsyncadd [#allocation3], 4294966016 }
  0x18   :  { %1105 = dma.done.wait [#allocation5], 20480  }
  0x19   :  { %1106 = vsyncadd [#allocation5], 4294946816  ;;  %v93_v0 = vld [vmem:[#allocation4 + $0xf8] sm:$0xff]  ;;  %v92_v2 = vld [vmem:[#allocation4 + $0xf0] sm:$0xff]  ;;  %vm1112_vm0 = vmmov 0   ;;  %vm767_vm1 = vcmask 15360  }
  0x1a   :  { %v77_v1 = vld [vmem:[#allocation4 + $0x78] sm:$0xff]  ;;  %778 = vmatprep.subr.mxu0 %v93_v0  ;;  %v76_v4 = vld [vmem:[#allocation4 + $0x70] sm:$0xff]  ;;  %v91_v6 = vld [vmem:[#allocation4 + $0xe8] sm:$0xff] }
  0x1b   :  { %v125_v3 = vld [vmem:[#allocation4 + $0x1f8] sm:$0xff]  ;;  %779 = vmatpush3.msra.mxu0 %v77_v1  ;;  %v124_v7 = vld [vmem:[#allocation4 + $0x1f0] sm:$0xff]  ;;  %v75_v8 = vld [vmem:[#allocation4 + $0x68] sm:$0xff] }
  0x1c   :  { %v109_v5 = vld [vmem:[#allocation4 + $0x178] sm:$0xff]  ;;  %813 = vmatprep.subr.mxu1 %v125_v3  ;;  %780 = vmatprep.subr.mxu0 %v92_v2  ;;  %v108_v9 = vld [vmem:[#allocation4 + $0x170] sm:$0xff]  ;;  %v123_v10 = vld [vmem:[#allocation4 + $0x1e8] sm:$0xff] }
  0x1d   :  { %814 = vmatpush3.msra.mxu1 %v109_v5  ;;  %781 = vmatpush3.msra.mxu0 %v76_v4  ;;  %v90_v11 = vld [vmem:[#allocation4 + $0xe0] sm:$0xff]  ;;  %v107_v12 = vld [vmem:[#allocation4 + $0x168] sm:$0xff]  ;;  %v89_v15 = vld [vmem:[#allocation4 + $0xd8] sm:$0xff] }
  0x1e   :  { %815 = vmatprep.subr.mxu1 %v124_v7  ;;  %782 = vmatprep.subr.mxu0 %v91_v6  ;;  %v74_v13 = vld [vmem:[#allocation4 + $0x60] sm:$0xff]  ;;  %v73_v17 = vld [vmem:[#allocation4 + $0x58] sm:$0xff]  ;;  %v88_v19 = vld [vmem:[#allocation4 + $0xd0] sm:$0xff] }
  0x1f   :  { %816 = vmatpush3.msra.mxu1 %v108_v9  ;;  %v122_v14 = vld [vmem:[#allocation4 + $0x1e0] sm:$0xff]  ;;  %783 = vmatpush3.msra.mxu0 %v75_v8  ;;  %v121_v18 = vld [vmem:[#allocation4 + $0x1d8] sm:$0xff]  ;;  %v72_v21 = vld [vmem:[#allocation4 + $0x50] sm:$0xff] }
  0x20   :  { %817 = vmatprep.subr.mxu1 %v123_v10  ;;  %v106_v16 = vld [vmem:[#allocation4 + $0x160] sm:$0xff]  ;;  %784 = vmatprep.subr.mxu0 %v90_v11  ;;  %v105_v20 = vld [vmem:[#allocation4 + $0x158] sm:$0xff]  ;;  %v120_v22 = vld [vmem:[#allocation4 + $0x1d0] sm:$0xff] }
  0x21   :  { %818 = vmatpush3.msra.mxu1 %v107_v12  ;;  %785 = vmatpush3.msra.mxu0 %v74_v13  ;;  %v87_v23 = vld [vmem:[#allocation4 + $0xc8] sm:$0xff]  ;;  %v104_v24 = vld [vmem:[#allocation4 + $0x150] sm:$0xff]  ;;  %v86_v27 = vld [vmem:[#allocation4 + $0xc0] sm:$0xff] }
  0x22   :  { %819 = vmatprep.subr.mxu1 %v122_v14  ;;  %786 = vmatprep.subr.mxu0 %v89_v15  ;;  %v71_v25 = vld [vmem:[#allocation4 + $0x48] sm:$0xff]  ;;  %v70_v29 = vld [vmem:[#allocation4 + $0x40] sm:$0xff]  ;;  %v85_v31 = vld [vmem:[#allocation4 + $0xb8] sm:$0xff] }
  0x23   :  { %820 = vmatpush3.msra.mxu1 %v106_v16  ;;  %787 = vmatpush3.msra.mxu0 %v73_v17  ;;  %v119_v26 = vld [vmem:[#allocation4 + $0x1c8] sm:$0xff]  ;;  %v118_v30 = vld [vmem:[#allocation4 + $0x1c0] sm:$0xff]  ;;  %v69_v33 = vld [vmem:[#allocation4 + $0x38] sm:$0xff] }
  0x24   :  { %821 = vmatprep.subr.mxu1 %v121_v18  ;;  %788 = vmatprep.subr.mxu0 %v88_v19  ;;  %v103_v28 = vld [vmem:[#allocation4 + $0x148] sm:$0xff]  ;;  %v102_v32 = vld [vmem:[#allocation4 + $0x140] sm:$0xff]  ;;  %v117_v34 = vld [vmem:[#allocation4 + $0x1b8] sm:$0xff] }
  0x25   :  { %822 = vmatpush3.msra.mxu1 %v105_v20  ;;  %789 = vmatpush3.msra.mxu0 %v72_v21  ;;  %v84_v35 = vld [vmem:[#allocation4 + $0xb0] sm:$0xff]  ;;  %v101_v36 = vld [vmem:[#allocation4 + $0x138] sm:$0xff]  ;;  %v83_v39 = vld [vmem:[#allocation4 + $0xa8] sm:$0xff] }
  0x26   :  { %823 = vmatprep.subr.mxu1 %v120_v22  ;;  %790 = vmatprep.subr.mxu0 %v87_v23  ;;  %v68_v37 = vld [vmem:[#allocation4 + $0x30] sm:$0xff]  ;;  %v67_v41 = vld [vmem:[#allocation4 + $0x28] sm:$0xff]  ;;  %v82_v43 = vld [vmem:[#allocation4 + $0xa0] sm:$0xff] }
  0x27   :  { %824 = vmatpush3.msra.mxu1 %v104_v24  ;;  %791 = vmatpush3.msra.mxu0 %v71_v25  ;;  %v116_v38 = vld [vmem:[#allocation4 + $0x1b0] sm:$0xff]  ;;  %v115_v42 = vld [vmem:[#allocation4 + $0x1a8] sm:$0xff]  ;;  %v66_v45 = vld [vmem:[#allocation4 + $0x20] sm:$0xff] }
  0x28   :  { %825 = vmatprep.subr.mxu1 %v119_v26  ;;  %792 = vmatprep.subr.mxu0 %v86_v27  ;;  %v100_v40 = vld [vmem:[#allocation4 + $0x130] sm:$0xff]  ;;  %v99_v44 = vld [vmem:[#allocation4 + $0x128] sm:$0xff]  ;;  %v114_v46 = vld [vmem:[#allocation4 + $0x1a0] sm:$0xff] }
  0x29   :  { %826 = vmatpush3.msra.mxu1 %v103_v28  ;;  %793 = vmatpush3.msra.mxu0 %v70_v29  ;;  %v81_v47 = vld [vmem:[#allocation4 + $0x98] sm:$0xff]  ;;  %v98_v48 = vld [vmem:[#allocation4 + $0x120] sm:$0xff]  ;;  %v80_v51 = vld [vmem:[#allocation4 + $0x90] sm:$0xff] }
  0x2a   :  { %827 = vmatprep.subr.mxu1 %v118_v30  ;;  %794 = vmatprep.subr.mxu0 %v85_v31  ;;  %v65_v49 = vld [vmem:[#allocation4 + $0x18] sm:$0xff]  ;;  %v64_v53 = vld [vmem:[#allocation4 + $0x10] sm:$0xff]  ;;  %v79_v55 = vld [vmem:[#allocation4 + $0x88] sm:$0xff] }
  0x2b   :  { %828 = vmatpush3.msra.mxu1 %v102_v32  ;;  %795 = vmatpush3.msra.mxu0 %v69_v33  ;;  %v113_v50 = vld [vmem:[#allocation4 + $0x198] sm:$0xff]  ;;  %v112_v54 = vld [vmem:[#allocation4 + $0x190] sm:$0xff]  ;;  %v63_v57 = vld [vmem:[#allocation4 + $0x8] sm:$0xff] }
  0x2c   :  { %829 = vmatprep.subr.mxu1 %v117_v34  ;;  %796 = vmatprep.subr.mxu0 %v84_v35  ;;  %v97_v52 = vld [vmem:[#allocation4 + $0x118] sm:$0xff]  ;;  %v96_v56 = vld [vmem:[#allocation4 + $0x110] sm:$0xff]  ;;  %v111_v58 = vld [vmem:[#allocation4 + $0x188] sm:$0xff] }
  0x2d   :  { %830 = vmatpush3.msra.mxu1 %v101_v36  ;;  %797 = vmatpush3.msra.mxu0 %v68_v37  ;;  %v78_v59 = vld [vmem:[#allocation4 + $0x80] sm:$0xff]  ;;  %v53_v60 = vld [vmem:[#allocation2 + $0x8] sm:$0xff]  ;;  %v95_v62 = vld [vmem:[#allocation4 + $0x108] sm:$0xff] }
  0x2e   :  { %831 = vmatprep.subr.mxu1 %v116_v38  ;;  %798 = vmatprep.subr.mxu0 %v83_v39  ;;  %v62_v61 = vld [vmem:[#allocation4] sm:$0xff]  ;;  %v52_v63 = vld [vmem:[#allocation2] sm:$0xff]  ;;  %v157_v1 = vld [vmem:[#allocation4 + $0x2f8] sm:$0xff] }
  0x2f   :  { %832 = vmatpush3.msra.mxu1 %v100_v40  ;;  %799 = vmatpush3.msra.mxu0 %v67_v41  ;;  %v110_v0 = vld [vmem:[#allocation4 + $0x180] sm:$0xff]  ;;  %v55_v3 = vld [vmem:[#allocation2 + $0x18] sm:$0xff]  ;;  %v141_v4 = vld [vmem:[#allocation4 + $0x278] sm:$0xff] }
  0x30   :  { %833 = vmatprep.subr.mxu1 %v115_v42  ;;  %800 = vmatprep.subr.mxu0 %v82_v43  ;;  %v94_v2 = vld [vmem:[#allocation4 + $0x100] sm:$0xff]  ;;  %v156_v6 = vld [vmem:[#allocation4 + $0x2f0] sm:$0xff]  ;;  %v189_v7 = vld [vmem:[#allocation4 + $0x3f8] sm:$0xff] }
  0x31   :  { %834 = vmatpush3.msra.mxu1 %v99_v44  ;;  %801 = vmatpush3.msra.mxu0 %v66_v45  ;;  %v54_v5 = vld [vmem:[#allocation2 + $0x10] sm:$0xff]  ;;  %v140_v8 = vld [vmem:[#allocation4 + $0x270] sm:$0xff]  ;;  %v173_v9 = vld [vmem:[#allocation4 + $0x378] sm:$0xff] }
  0x32   :  { %835 = vmatprep.subr.mxu1 %v114_v46  ;;  %802 = vmatprep.subr.mxu0 %v81_v47  ;;  %v155_v10 = vld [vmem:[#allocation4 + $0x2e8] sm:$0xff]  ;;  %v188_v11 = vld [vmem:[#allocation4 + $0x3f0] sm:$0xff]  ;;  %v154_v14 = vld [vmem:[#allocation4 + $0x2e0] sm:$0xff] }
  0x33   :  { %836 = vmatpush3.msra.mxu1 %v98_v48  ;;  %803 = vmatpush3.msra.mxu0 %v65_v49  ;;  %v139_v12 = vld [vmem:[#allocation4 + $0x268] sm:$0xff]  ;;  %v172_v13 = vld [vmem:[#allocation4 + $0x370] sm:$0xff]  ;;  %v138_v16 = vld [vmem:[#allocation4 + $0x260] sm:$0xff] }
  0x34   :  { %837 = vmatprep.subr.mxu1 %v113_v50  ;;  %804 = vmatprep.subr.mxu0 %v80_v51  ;;  %v187_v15 = vld [vmem:[#allocation4 + $0x3e8] sm:$0xff]  ;;  %v153_v18 = vld [vmem:[#allocation4 + $0x2d8] sm:$0xff]  ;;  %v186_v19 = vld [vmem:[#allocation4 + $0x3e0] sm:$0xff] }
  0x35   :  { %838 = vmatpush3.msra.mxu1 %v97_v52  ;;  %805 = vmatpush3.msra.mxu0 %v64_v53  ;;  %v171_v17 = vld [vmem:[#allocation4 + $0x368] sm:$0xff]  ;;  %v137_v20 = vld [vmem:[#allocation4 + $0x258] sm:$0xff]  ;;  %v170_v21 = vld [vmem:[#allocation4 + $0x360] sm:$0xff] }
  0x36   :  { %839 = vmatprep.subr.mxu1 %v112_v54  ;;  %806 = vmatprep.subr.mxu0 %v79_v55  ;;  %v152_v22 = vld [vmem:[#allocation4 + $0x2d0] sm:$0xff]  ;;  %v185_v23 = vld [vmem:[#allocation4 + $0x3d8] sm:$0xff]  ;;  %v151_v26 = vld [vmem:[#allocation4 + $0x2c8] sm:$0xff] }
  0x37   :  { %840 = vmatpush3.msra.mxu1 %v96_v56  ;;  %807 = vmatpush3.msra.mxu0 %v63_v57  ;;  %v136_v24 = vld [vmem:[#allocation4 + $0x250] sm:$0xff]  ;;  %v169_v25 = vld [vmem:[#allocation4 + $0x358] sm:$0xff]  ;;  %v135_v28 = vld [vmem:[#allocation4 + $0x248] sm:$0xff] }
  0x38   :  { %841 = vmatprep.subr.mxu1 %v111_v58  ;;  %808 = vmatprep.subr.mxu0 %v78_v59  ;;  %v184_v27 = vld [vmem:[#allocation4 + $0x3d0] sm:$0xff]  ;;  %v150_v30 = vld [vmem:[#allocation4 + $0x2c0] sm:$0xff]  ;;  %v183_v31 = vld [vmem:[#allocation4 + $0x3c8] sm:$0xff] }
  0x39   :  { %293 = vmatprep.mubr.f32.mxu0 %v53_v60  ;;  %809 = vmatpush3.msra.mxu0 %v62_v61  ;;  %v168_v29 = vld [vmem:[#allocation4 + $0x350] sm:$0xff]  ;;  %v134_v32 = vld [vmem:[#allocation4 + $0x240] sm:$0xff]  ;;  %v167_v33 = vld [vmem:[#allocation4 + $0x348] sm:$0xff] }
  0x3a   :  { %842 = vmatpush3.msra.mxu1 %v95_v62  ;;  %294 = vmatmul.mubr.f32.vlgmr.msra.gmra.mxu0 %v52_v63  ;;  %v149_v34 = vld [vmem:[#allocation4 + $0x2b8] sm:$0xff]  ;;  %v182_v35 = vld [vmem:[#allocation4 + $0x3c0] sm:$0xff]  ;;  %v148_v38 = vld [vmem:[#allocation4 + $0x2b0] sm:$0xff] }
  0x3b   :  { %843 = vmatprep.subr.mxu1 %v110_v0  ;;  %848 = vmatprep.subr.mxu0 %v157_v1  ;;  %v133_v36 = vld [vmem:[#allocation4 + $0x238] sm:$0xff]  ;;  %v166_v37 = vld [vmem:[#allocation4 + $0x340] sm:$0xff]  ;;  %v132_v40 = vld [vmem:[#allocation4 + $0x230] sm:$0xff] }
  0x3c   :  { %844 = vmatpush3.msra.mxu1 %v94_v2  ;;  %363 = vmatprep.mubr.f32.mxu1 %v55_v3  ;;  %v181_v39 = vld [vmem:[#allocation4 + $0x3b8] sm:$0xff]  ;;  %v147_v42 = vld [vmem:[#allocation4 + $0x2a8] sm:$0xff]  ;;  %v180_v43 = vld [vmem:[#allocation4 + $0x3b0] sm:$0xff] }
  0x3d   :  { %849 = vmatpush3.msra.mxu0 %v141_v4  ;;  %364 = vmatmul.mubr.f32.vlgmr.msra.gmra.mxu1 %v54_v5  ;;  %v165_v41 = vld [vmem:[#allocation4 + $0x338] sm:$0xff]  ;;  %v131_v44 = vld [vmem:[#allocation4 + $0x228] sm:$0xff]  ;;  %v164_v45 = vld [vmem:[#allocation4 + $0x330] sm:$0xff] }
  0x3e   :  { %850 = vmatprep.subr.mxu0 %v156_v6  ;;  %883 = vmatprep.subr.mxu1 %v189_v7  ;;  %v146_v46 = vld [vmem:[#allocation4 + $0x2a0] sm:$0xff]  ;;  %v179_v47 = vld [vmem:[#allocation4 + $0x3a8] sm:$0xff]  ;;  %v145_v50 = vld [vmem:[#allocation4 + $0x298] sm:$0xff] }
  0x3f   :  { %851 = vmatpush3.msra.mxu0 %v140_v8  ;;  %884 = vmatpush3.msra.mxu1 %v173_v9  ;;  %v130_v48 = vld [vmem:[#allocation4 + $0x220] sm:$0xff]  ;;  %v163_v49 = vld [vmem:[#allocation4 + $0x328] sm:$0xff]  ;;  %v129_v52 = vld [vmem:[#allocation4 + $0x218] sm:$0xff] }
  0x40   :  { %852 = vmatprep.subr.mxu0 %v155_v10  ;;  %885 = vmatprep.subr.mxu1 %v188_v11  ;;  %v178_v51 = vld [vmem:[#allocation4 + $0x3a0] sm:$0xff]  ;;  %v144_v54 = vld [vmem:[#allocation4 + $0x290] sm:$0xff]  ;;  %v177_v55 = vld [vmem:[#allocation4 + $0x398] sm:$0xff] }
  0x41   :  { %853 = vmatpush3.msra.mxu0 %v139_v12  ;;  %886 = vmatpush3.msra.mxu1 %v172_v13  ;;  %v162_v53 = vld [vmem:[#allocation4 + $0x320] sm:$0xff]  ;;  %v128_v56 = vld [vmem:[#allocation4 + $0x210] sm:$0xff]  ;;  %v161_v57 = vld [vmem:[#allocation4 + $0x318] sm:$0xff] }
  0x42   :  { %854 = vmatprep.subr.mxu0 %v154_v14  ;;  %887 = vmatprep.subr.mxu1 %v187_v15  ;;  %v143_v58 = vld [vmem:[#allocation4 + $0x288] sm:$0xff]  ;;  %v176_v59 = vld [vmem:[#allocation4 + $0x390] sm:$0xff]  ;;  %v142_v62 = vld [vmem:[#allocation4 + $0x280] sm:$0xff] }
  0x43   :  { %855 = vmatpush3.msra.mxu0 %v138_v16  ;;  %888 = vmatpush3.msra.mxu1 %v171_v17  ;;  %v127_v60 = vld [vmem:[#allocation4 + $0x208] sm:$0xff]  ;;  %v160_v61 = vld [vmem:[#allocation4 + $0x310] sm:$0xff]  ;;  %v126_v0 = vld [vmem:[#allocation4 + $0x200] sm:$0xff] }
  0x44   :  { %856 = vmatprep.subr.mxu0 %v153_v18  ;;  %889 = vmatprep.subr.mxu1 %v186_v19  ;;  %v175_v63 = vld [vmem:[#allocation4 + $0x388] sm:$0xff]  ;;  %v57_v1 = vld [vmem:[#allocation2 + $0x28] sm:$0xff]  ;;  %v56_v3 = vld [vmem:[#allocation2 + $0x20] sm:$0xff] }
  0x45   :  { %857 = vmatpush3.msra.mxu0 %v137_v20  ;;  %890 = vmatpush3.msra.mxu1 %v170_v21  ;;  %v159_v2 = vld [vmem:[#allocation4 + $0x308] sm:$0xff]  ;;  %v174_v4 = vld [vmem:[#allocation4 + $0x380] sm:$0xff]  ;;  %v221_v5 = vld [vmem:[#allocation4 + $0x4f8] sm:$0xff] }
  0x46   :  { %858 = vmatprep.subr.mxu0 %v152_v22  ;;  %891 = vmatprep.subr.mxu1 %v185_v23  ;;  %v158_v6 = vld [vmem:[#allocation4 + $0x300] sm:$0xff]  ;;  %v59_v7 = vld [vmem:[#allocation2 + $0x38] sm:$0xff]  ;;  %v205_v8 = vld [vmem:[#allocation4 + $0x478] sm:$0xff] }
  0x47   :  { %859 = vmatpush3.msra.mxu0 %v136_v24  ;;  %892 = vmatpush3.msra.mxu1 %v169_v25  ;;  %v58_v9 = vld [vmem:[#allocation2 + $0x30] sm:$0xff]  ;;  %v220_v10 = vld [vmem:[#allocation4 + $0x4f0] sm:$0xff]  ;;  %v61_v12 = vld [vmem:[#allocation2 + $0x48] sm:$0xff] }
  0x48   :  { %860 = vmatprep.subr.mxu0 %v151_v26  ;;  %893 = vmatprep.subr.mxu1 %v184_v27  ;;  %v204_v11 = vld [vmem:[#allocation4 + $0x470] sm:$0xff]  ;;  %v219_v13 = vld [vmem:[#allocation4 + $0x4e8] sm:$0xff]  ;;  %v218_v15 = vld [vmem:[#allocation4 + $0x4e0] sm:$0xff] }
  0x49   :  { %861 = vmatpush3.msra.mxu0 %v135_v28  ;;  %894 = vmatpush3.msra.mxu1 %v168_v29  ;;  %v203_v14 = vld [vmem:[#allocation4 + $0x468] sm:$0xff]  ;;  %v202_v16 = vld [vmem:[#allocation4 + $0x460] sm:$0xff]  ;;  %v217_v17 = vld [vmem:[#allocation4 + $0x4d8] sm:$0xff] }
  0x4a   :  { %862 = vmatprep.subr.mxu0 %v150_v30  ;;  %895 = vmatprep.subr.mxu1 %v183_v31  ;;  %v201_v18 = vld [vmem:[#allocation4 + $0x458] sm:$0xff]  ;;  %v216_v19 = vld [vmem:[#allocation4 + $0x4d0] sm:$0xff]  ;;  %v215_v21 = vld [vmem:[#allocation4 + $0x4c8] sm:$0xff] }
  0x4b   :  { %863 = vmatpush3.msra.mxu0 %v134_v32  ;;  %896 = vmatpush3.msra.mxu1 %v167_v33  ;;  %v200_v20 = vld [vmem:[#allocation4 + $0x450] sm:$0xff]  ;;  %v199_v22 = vld [vmem:[#allocation4 + $0x448] sm:$0xff]  ;;  %v214_v23 = vld [vmem:[#allocation4 + $0x4c0] sm:$0xff] }
  0x4c   :  { %864 = vmatprep.subr.mxu0 %v149_v34  ;;  %897 = vmatprep.subr.mxu1 %v182_v35  ;;  %v198_v24 = vld [vmem:[#allocation4 + $0x440] sm:$0xff]  ;;  %v213_v25 = vld [vmem:[#allocation4 + $0x4b8] sm:$0xff]  ;;  %v212_v27 = vld [vmem:[#allocation4 + $0x4b0] sm:$0xff] }
  0x4d   :  { %865 = vmatpush3.msra.mxu0 %v133_v36  ;;  %898 = vmatpush3.msra.mxu1 %v166_v37  ;;  %v197_v26 = vld [vmem:[#allocation4 + $0x438] sm:$0xff]  ;;  %v196_v28 = vld [vmem:[#allocation4 + $0x430] sm:$0xff]  ;;  %v211_v29 = vld [vmem:[#allocation4 + $0x4a8] sm:$0xff] }
  0x4e   :  { %866 = vmatprep.subr.mxu0 %v148_v38  ;;  %899 = vmatprep.subr.mxu1 %v181_v39  ;;  %v195_v30 = vld [vmem:[#allocation4 + $0x428] sm:$0xff]  ;;  %v210_v31 = vld [vmem:[#allocation4 + $0x4a0] sm:$0xff]  ;;  %v209_v33 = vld [vmem:[#allocation4 + $0x498] sm:$0xff] }
  0x4f   :  { %867 = vmatpush3.msra.mxu0 %v132_v40  ;;  %900 = vmatpush3.msra.mxu1 %v165_v41  ;;  %v194_v32 = vld [vmem:[#allocation4 + $0x420] sm:$0xff]  ;;  %v193_v34 = vld [vmem:[#allocation4 + $0x418] sm:$0xff]  ;;  %v208_v35 = vld [vmem:[#allocation4 + $0x490] sm:$0xff] }
  0x50   :  { %868 = vmatprep.subr.mxu0 %v147_v42  ;;  %901 = vmatprep.subr.mxu1 %v180_v43  ;;  %v192_v36 = vld [vmem:[#allocation4 + $0x410] sm:$0xff]  ;;  %v207_v37 = vld [vmem:[#allocation4 + $0x488] sm:$0xff]  ;;  %v206_v39 = vld [vmem:[#allocation4 + $0x480] sm:$0xff]  ;;  %v1111_v43 = vmov 0.0  }
  0x51   :  { %869 = vmatpush3.msra.mxu0 %v131_v44  ;;  %902 = vmatpush3.msra.mxu1 %v164_v45  ;;  %v191_v38 = vld [vmem:[#allocation4 + $0x408] sm:$0xff]  ;;  %v190_v40 = vld [vmem:[#allocation4 + $0x400] sm:$0xff]  ;;  %v60_v41 = vld [vmem:[#allocation2 + $0x40] sm:$0xff] }
  0x52   :  { %870 = vmatprep.subr.mxu0 %v146_v46  ;;  %903 = vmatprep.subr.mxu1 %v179_v47  ;;  %v595_v42 = vld [vmem:[%s1304_s3 + $0x78] sm:$0xff]  ;;  %v594_v44 = vld [vmem:[%s1304_s3 + $0x70] sm:$0xff]  ;;  %v593_v45 = vld [vmem:[%s1304_s3 + $0x68] sm:$0xff] }
  0x53   :  { %871 = vmatpush3.msra.mxu0 %v130_v48  ;;  %904 = vmatpush3.msra.mxu1 %v163_v49  ;;  %v592_v46 = vld [vmem:[%s1304_s3 + $0x60] sm:$0xff]  ;;  %v591_v47 = vld [vmem:[%s1304_s3 + $0x58] sm:$0xff]  ;;  %v590_v48 = vld [vmem:[%s1304_s3 + $0x50] sm:$0xff] }
  0x54   :  { %872 = vmatprep.subr.mxu0 %v145_v50  ;;  %905 = vmatprep.subr.mxu1 %v178_v51  ;;  %v589_v49 = vld [vmem:[%s1304_s3 + $0x48] sm:$0xff]  ;;  %v588_v50 = vld [vmem:[%s1304_s3 + $0x40] sm:$0xff]  ;;  %v587_v51 = vld [vmem:[%s1304_s3 + $0x38] sm:$0xff] }
  0x55   :  { %873 = vmatpush3.msra.mxu0 %v129_v52  ;;  %906 = vmatpush3.msra.mxu1 %v162_v53  ;;  %v586_v52 = vld [vmem:[%s1304_s3 + $0x30] sm:$0xff]  ;;  %v585_v53 = vld [vmem:[%s1304_s3 + $0x28] sm:$0xff] }
  0x56   :  { %874 = vmatprep.subr.mxu0 %v144_v54  ;;  %907 = vmatprep.subr.mxu1 %v177_v55  ;;  %v584_v54 = vld [vmem:[%s1304_s3 + $0x20] sm:$0xff]  ;;  %v583_v55 = vld [vmem:[%s1304_s3 + $0x18] sm:$0xff] }
  0x57   :  { %875 = vmatpush3.msra.mxu0 %v128_v56  ;;  %908 = vmatpush3.msra.mxu1 %v161_v57  ;;  %v582_v56 = vld [vmem:[%s1304_s3 + $0x10] sm:$0xff]  ;;  %v581_v57 = vld [vmem:[%s1304_s3 + $0x8] sm:$0xff] }
  0x58   :  { %876 = vmatprep.subr.mxu0 %v143_v58  ;;  %909 = vmatprep.subr.mxu1 %v176_v59  ;;  %v580_v58 = vld [vmem:[%s1304_s3] sm:$0xff]  ;;  %v689_v59 = vld [vmem:[%s1306_s5 + $0x78] sm:$0xff] }
  0x59   :  { %877 = vmatpush3.msra.mxu0 %v127_v60  ;;  %910 = vmatpush3.msra.mxu1 %v160_v61  ;;  %v688_v60 = vld [vmem:[%s1306_s5 + $0x70] sm:$0xff]  ;;  %v687_v61 = vld [vmem:[%s1306_s5 + $0x68] sm:$0xff] }
  0x5a   :  { %878 = vmatprep.subr.mxu0 %v142_v62  ;;  %911 = vmatprep.subr.mxu1 %v175_v63  ;;  %v686_v62 = vld [vmem:[%s1306_s5 + $0x60] sm:$0xff]  ;;  %v685_v63 = vld [vmem:[%s1306_s5 + $0x58] sm:$0xff] }
  0x5b   :  { %879 = vmatpush3.msra.mxu0 %v126_v0  ;;  %433 = vmatprep.mubr.f32.mxu0 %v57_v1  ;;  %v684_v0 = vld [vmem:[%s1306_s5 + $0x50] sm:$0xff]  ;;  %v683_v1 = vld [vmem:[%s1306_s5 + $0x48] sm:$0xff] }
  0x5c   :  { %912 = vmatpush3.msra.mxu1 %v159_v2  ;;  %434 = vmatmul.mubr.f32.vlgmr.msra.gmra.mxu0 %v56_v3  ;;  %v682_v2 = vld [vmem:[%s1306_s5 + $0x40] sm:$0xff]  ;;  %v681_v3 = vld [vmem:[%s1306_s5 + $0x38] sm:$0xff] }
  0x5d   :  { %913 = vmatprep.subr.mxu1 %v174_v4  ;;  %918 = vmatprep.subr.mxu0 %v221_v5  ;;  %v680_v4 = vld [vmem:[%s1306_s5 + $0x30] sm:$0xff]  ;;  %v679_v5 = vld [vmem:[%s1306_s5 + $0x28] sm:$0xff] }
  0x5e   :  { %914 = vmatpush3.msra.mxu1 %v158_v6  ;;  %503 = vmatprep.mubr.f32.mxu1 %v59_v7  ;;  %v678_v6 = vld [vmem:[%s1306_s5 + $0x20] sm:$0xff]  ;;  %v677_v7 = vld [vmem:[%s1306_s5 + $0x18] sm:$0xff] }
  0x5f   :  { %919 = vmatpush3.msra.mxu0 %v205_v8  ;;  %504 = vmatmul.mubr.f32.vlgmr.msra.gmra.mxu1 %v58_v9 }
  0x60   :  { %920 = vmatprep.subr.mxu0 %v220_v10  ;;  %573 = vmatprep.mubr.f32.mxu0 %v61_v12 }
  0x61   :  { %921 = vmatpush3.msra.mxu0 %v204_v11  ;;  %987 = vmatprep.subr.mxu1 %v1111_v43 }
  0x62   :  { %922 = vmatprep.subr.mxu0 %v219_v13  ;;  %988 = vmatpush3.msra.mxu1 %v595_v42  ;;  %v775_v13 = vld [vmem:[%s1303_s2] ss:$0 sm:$0xff] }
  0x63   :  { %923 = vmatpush3.msra.mxu0 %v203_v14  ;;  %989 = vmatprep.subr.mxu1 %v1111_v43 }
  0x64   :  { %924 = vmatprep.subr.mxu0 %v218_v15  ;;  %990 = vmatpush3.msra.mxu1 %v594_v44 }
  0x65   :  { %925 = vmatpush3.msra.mxu0 %v202_v16  ;;  %991 = vmatprep.subr.mxu1 %v1111_v43 }
  0x66   :  { %926 = vmatprep.subr.mxu0 %v217_v17  ;;  %992 = vmatpush3.msra.mxu1 %v593_v45 }
  0x67   :  { %927 = vmatpush3.msra.mxu0 %v201_v18  ;;  %993 = vmatprep.subr.mxu1 %v1111_v43 }
  0x68   :  { %928 = vmatprep.subr.mxu0 %v216_v19  ;;  %994 = vmatpush3.msra.mxu1 %v592_v46 }
  0x69   :  { %929 = vmatpush3.msra.mxu0 %v200_v20  ;;  %995 = vmatprep.subr.mxu1 %v1111_v43 }
  0x6a   :  { %930 = vmatprep.subr.mxu0 %v215_v21  ;;  %996 = vmatpush3.msra.mxu1 %v591_v47 }
  0x6b   :  { %931 = vmatpush3.msra.mxu0 %v199_v22  ;;  %997 = vmatprep.subr.mxu1 %v1111_v43 }
  0x6c   :  { %932 = vmatprep.subr.mxu0 %v214_v23  ;;  %998 = vmatpush3.msra.mxu1 %v590_v48 }
  0x6d   :  { %933 = vmatpush3.msra.mxu0 %v198_v24  ;;  %999 = vmatprep.subr.mxu1 %v1111_v43 }
  0x6e   :  { %934 = vmatprep.subr.mxu0 %v213_v25  ;;  %1000 = vmatpush3.msra.mxu1 %v589_v49 }
  0x6f   :  { %935 = vmatpush3.msra.mxu0 %v197_v26  ;;  %1001 = vmatprep.subr.mxu1 %v1111_v43 }
  0x70   :  { %936 = vmatprep.subr.mxu0 %v212_v27  ;;  %1002 = vmatpush3.msra.mxu1 %v588_v50 }
  0x71   :  { %937 = vmatpush3.msra.mxu0 %v196_v28  ;;  %1003 = vmatprep.subr.mxu1 %v1111_v43 }
  0x72   :  { %938 = vmatprep.subr.mxu0 %v211_v29  ;;  %1004 = vmatpush3.msra.mxu1 %v587_v51 }
  0x73   :  { %939 = vmatpush3.msra.mxu0 %v195_v30  ;;  %1005 = vmatprep.subr.mxu1 %v1111_v43  ;;  %v676_v30 = vld [vmem:[%s1306_s5 + $0x10] sm:$0xff] }
  0x74   :  { %940 = vmatprep.subr.mxu0 %v210_v31  ;;  %1006 = vmatpush3.msra.mxu1 %v586_v52  ;;  %v675_v31 = vld [vmem:[%s1306_s5 + $0x8] sm:$0xff] }
  0x75   :  { %941 = vmatpush3.msra.mxu0 %v194_v32  ;;  %1007 = vmatprep.subr.mxu1 %v1111_v43  ;;  %v674_v32 = vld [vmem:[%s1306_s5] sm:$0xff] }
  0x76   :  { %942 = vmatprep.subr.mxu0 %v209_v33  ;;  %1008 = vmatpush3.msra.mxu1 %v585_v53  ;;  %v776_v33 = vld [vmem:[%s1305_s4] ss:$0 sm:$0xff] }
  0x77   :  { %943 = vmatpush3.msra.mxu0 %v193_v34  ;;  %1009 = vmatprep.subr.mxu1 %v1111_v43 }
  0x78   :  { %944 = vmatprep.subr.mxu0 %v208_v35  ;;  %1010 = vmatpush3.msra.mxu1 %v584_v54 }
  0x79   :  { %945 = vmatpush3.msra.mxu0 %v192_v36  ;;  %1011 = vmatprep.subr.mxu1 %v1111_v43 }
  0x7a   :  { %946 = vmatprep.subr.mxu0 %v207_v37  ;;  %1012 = vmatpush3.msra.mxu1 %v583_v55 }
  0x7b   :  { %947 = vmatpush3.msra.mxu0 %v191_v38  ;;  %1013 = vmatprep.subr.mxu1 %v1111_v43  ;;  %v777_v38 = vld [vmem:[%s1307_s6] ss:$0 sm:$0xff] }
  0x7c   :  { %948 = vmatprep.subr.mxu0 %v206_v39  ;;  %1014 = vmatpush3.msra.mxu1 %v582_v56 }
  0x7d   :  { %949 = vmatpush3.msra.mxu0 %v190_v40  ;;  %1015 = vmatprep.subr.mxu1 %v1111_v43 }
  0x7e   :  { %574 = vmatmul.mubr.f32.vlgmr.msra.gmra.mxu0 %v60_v41  ;;  %1022 = vmatprep.subr.mxu0 %v1111_v43 }
  0x7f   :  { %1016 = vmatpush3.msra.mxu1 %v581_v57  ;;  %1019 = vmatprep.mubr.msk.f32.mxu1 %vm1112_vm0, %v1111_v43 }
  0x80   :  { %1017 = vmatprep.subr.mxu1 %v1111_v43  ;;  %1054 = vmatprep.mubr.msk.f32.mxu0 %vm1112_vm0, %v1111_v43 }
  0x81   :  { %1018 = vmatpush3.msra.mxu1 %v580_v58  ;;  %1023 = vmatpush3.msra.mxu0 %v689_v59 }
  0x82   :  { %1024 = vmatprep.subr.mxu0 %v1111_v43 }
  0x83   :  { %1025 = vmatpush3.msra.mxu0 %v688_v60 }
  0x84   :  { %1026 = vmatprep.subr.mxu0 %v1111_v43 }
  0x85   :  { %1027 = vmatpush3.msra.mxu0 %v687_v61 }
  0x86   :  { %1028 = vmatprep.subr.mxu0 %v1111_v43 }
  0x87   :  { %1029 = vmatpush3.msra.mxu0 %v686_v62 }
  0x88   :  { %1030 = vmatprep.subr.mxu0 %v1111_v43 }
  0x89   :  { %1031 = vmatpush3.msra.mxu0 %v685_v63 }
  0x8a   :  { %1032 = vmatprep.subr.mxu0 %v1111_v43 }
  0x8b   :  { %1033 = vmatpush3.msra.mxu0 %v684_v0 }
  0x8c   :  { %1034 = vmatprep.subr.mxu0 %v1111_v43 }
  0x8d   :  { %1035 = vmatpush3.msra.mxu0 %v683_v1 }
  0x8e   :  { %1036 = vmatprep.subr.mxu0 %v1111_v43 }
  0x8f   :  { %1037 = vmatpush3.msra.mxu0 %v682_v2 }
  0x90   :  { %1038 = vmatprep.subr.mxu0 %v1111_v43 }
  0x91   :  { %1039 = vmatpush3.msra.mxu0 %v681_v3 }
  0x92   :  { %1040 = vmatprep.subr.mxu0 %v1111_v43 }
  0x93   :  { %1041 = vmatpush3.msra.mxu0 %v680_v4 }
  0x94   :  { %1042 = vmatprep.subr.mxu0 %v1111_v43 }
  0x95   :  { %1043 = vmatpush3.msra.mxu0 %v679_v5 }
  0x96   :  { %1044 = vmatprep.subr.mxu0 %v1111_v43 }
  0x97   :  { %1045 = vmatpush3.msra.mxu0 %v678_v6 }
  0x98   :  { %1046 = vmatprep.subr.mxu0 %v1111_v43 }
  0x99   :  { %1047 = vmatpush3.msra.mxu0 %v677_v7 }
  0x9a   :  { %1048 = vmatprep.subr.mxu0 %v1111_v43 }
  0x9b   :  { %1049 = vmatpush3.msra.mxu0 %v676_v30 }
  0x9c   :  { %1050 = vmatprep.subr.mxu0 %v1111_v43 }
  0x9d   :  { %1051 = vmatpush3.msra.mxu0 %v675_v31 }
  0x9e   :  { %1052 = vmatprep.subr.mxu0 %v1111_v43 }
  0x9f   :  { %1053 = vmatpush3.msra.mxu0 %v674_v32 }
  0xfa   :  { %v810_v8 = vpop.f32.mrf.mxu0 }
  0xfc   :  { %v811_v9 = vpop.f32.mrf.mxu0 }
  0xfd   :  { %v845_v10 = vpop.f32.mrf.mxu1  ;;  %v812_v12 = vadd.f32 %v811_v9, %v810_v8 }
  0xff   :  { %v846_v14 = vpop.f32.mrf.mxu1  ;;  %v296_v17 = vadd.f32 %v812_v12, %v775_v13 }
 0x100   :  { %v847_v18 = vadd.f32 %v846_v14, %v845_v10 }
 0x102   :  { %v366_v21 = vadd.f32 %v847_v18, %v296_v17 }
 0x11c   :  { %v880_v11 = vpop.f32.mrf.mxu0 }
 0x11e   :  { %v881_v15 = vpop.f32.mrf.mxu0 }
 0x11f   :  { %v915_v16 = vpop.f32.mrf.mxu1  ;;  %v882_v19 = vadd.f32 %v881_v15, %v880_v11 }
 0x121   :  { %v916_v20 = vpop.f32.mrf.mxu1  ;;  %v436_v22 = vadd.f32 %v882_v19, %v366_v21 }
 0x122   :  { %v917_v23 = vadd.f32 %v916_v20, %v915_v16 }
 0x124   :  { %v506_v26 = vadd.f32 %v917_v23, %v436_v22 }
 0x13e   :  { %v950_v24 = vpop.f32.mrf.mxu0 }
 0x140   :  { %v951_v25 = vpop.f32.mrf.mxu0 }
 0x141   :  { %v952_v27 = vadd.f32 %v951_v25, %v950_v24 }
 0x143   :  { %v576_v28 = vadd.f32 %v952_v27, %v506_v26 }
 0x145   :  { %v579_v29 = vmax.f32 %v576_v28, 0.0 }
 0x147   :  { %1020 = vmatmul.mubr.f32.vlgmr.msra.gmra.mxu1 %v579_v29 }
 0x207   :  { %v669_v34 = vpop.f32.mrf.mxu1 }
 0x208   :  { %v670_v35 = vadd.f32 %v776_v33, %v669_v34 }
 0x209   :  { %v1021_v36 = vpop.f32.mrf.mxu1 }
 0x20a   :  { %v673_v37 = vmax.f32 %v670_v35, 0.0 }
 0x20c   :  { %1055 = vmatmul.mubr.f32.vlgmr.msra.gmra.mxu0 %v673_v37 }
 0x2cc   :  { %v763_v39 = vpop.f32.mrf.mxu0 }
 0x2cd   :  { %v764_v40 = vadd.f32 %v777_v38, %v763_v39 }
 0x2ce   :  { %v1056_v41 = vpop.f32.mrf.mxu0 }
 0x2cf   :  { %768 = vst.msk [vmem:[%s1308_s7] sm:$0xff] %vm767_vm1, %v764_v40 }
 0x2d0   :  { %773 = vsyncpa [#allocation3], 1 }
 0x2d1   :  { %774 = vsyncpa [#allocation5], 1 }

</bundles_post_ra>
